<compile_context>
chip_gen: v5e
topology: v5e:2x2
jax: 0.10.0
libtpu: 0.0.40
codegen_flags: <defaults>
</compile_context>

<pallas_src>
import functools

import jax
import jax.numpy as jnp
import numpy as np
from jax import lax
from jax.experimental import pallas as pl
from jax.experimental.pallas import tpu as pltpu


# --------------------------------------------------------------------------
# Kernel 1: time-sum reduction, streamed over T, split across cores.
# --------------------------------------------------------------------------
def _tsum_kernel(v_ref, out_ref):
    """v_ref: (B, t_tile, D) tile of visual_emb; out_ref: (B, D) f32 partial."""
    @pl.when(pl.program_id(1) == 0)
    def _():
        out_ref[...] = jnp.zeros_like(out_ref)

    # Upcast per-tile in vregs; HBM traffic stays in the input's native dtype.
    out_ref[...] += jnp.sum(v_ref[...].astype(jnp.float32), axis=1)


# --------------------------------------------------------------------------
# Kernel 2: combine partials, similarity matmul, symmetric cross-entropy.
# --------------------------------------------------------------------------
def _epilogue_kernel(scale, p_ref, t_ref, o_ref):
    """p_ref: (num_splits, B, D) f32 partial sums; t_ref: (B, D); o_ref: (1,1) SMEM."""
    vsum = jnp.sum(p_ref[...], axis=0)                               # (B, D) f32
    v_mean = vsum * scale                                            # mean/T and 1/temp folded
    t = t_ref[...].astype(jnp.float32)                               # (B, D) f32

    # sim[i, j] = <v_mean[i], t[j]> : contract D with D, no transpose.
    sim = lax.dot_general(
        v_mean, t,
        dimension_numbers=(((1,), (1,)), ((), ())),
        preferred_element_type=jnp.float32)                          # (B, B)

    # diag(sim)[i] = <v_mean[i], t[i]>  -> one (B, D) elementwise reduce,
    # shared by both CE directions (no (B,B) iota/eye temporaries).
    diag_sum = jnp.sum(v_mean * t)

    # Row-wise LSE (visual -> text).
    m_r = jnp.max(sim, axis=1, keepdims=True)
    lse_r = m_r + jnp.log(jnp.sum(jnp.exp(sim - m_r), axis=1, keepdims=True))

    # Column-wise LSE (text -> visual), i.e. CE on sim.T.
    m_c = jnp.max(sim, axis=0, keepdims=True)
    lse_c = m_c + jnp.log(jnp.sum(jnp.exp(sim - m_c), axis=0, keepdims=True))

    # TODO(synk): for very large B (>~1024 on v7x) block the CE over column
    # tiles (flash-style running LSE) instead of materializing full (B, B) sim.
    b = sim.shape[0]
    loss = (jnp.sum(lse_r) + jnp.sum(lse_c) - 2.0 * diag_sum) / (2.0 * b)
    o_ref[0, 0] = loss


# --------------------------------------------------------------------------
# Tiling helpers.
# --------------------------------------------------------------------------
def _vmem_capacity_bytes():
    try:
        return int(pltpu.get_tpu_info().vmem_capacity_bytes)
    except Exception:
        return 64 << 20  # conservative (v7x-sized) fallback


def _pick_time_tile(T, row_bytes, sub, budget_bytes):
    """Time-tile rows: sublane-aligned, one buffer within `budget_bytes`.

    Never falls back to the whole (possibly huge) T; if no aligned divisor of T
    fits, returns the largest aligned tile that fits (the wrapper zero-pads T).
    """
    cap_rows = budget_bytes // max(1, row_bytes)
    cap_rows = max(sub, (cap_rows // sub) * sub)
    if T <= cap_rows:
        # Whole T fits in one buffer; round up to the sublane packing.
        return min(cap_rows, ((T + sub - 1) // sub) * sub)
    # Prefer an exact sublane-aligned divisor of T (no padding needed).
    best = 0
    for d in range(sub, cap_rows + 1, sub):
        if T % d == 0:
            best = d
    if best:
        return best
    return cap_rows  # wrapper pads T with zeros (zeros don't change the sum)


# --------------------------------------------------------------------------
# Wrapper.
# --------------------------------------------------------------------------
def ntxent_loss(visual_emb, text_emb, temperature=0.07, max_tile_rows=None):
    """Pallas-backed NT-Xent loss.  visual_emb: (B, T, D), text_emb: (B, D)."""
    B, T, D = visual_emb.shape
    itemsize = jnp.dtype(visual_emb.dtype).itemsize
    t_itemsize = jnp.dtype(text_emb.dtype).itemsize
    sub = max(8, 32 // itemsize)            # native sublane packing: 8 f32 / 16 bf16 / 32 int8

    vmem_cap = _vmem_capacity_bytes()
    buffer_budget = max(4 << 20, vmem_cap // 8)   # ~8 MiB/buffer v7x, ~16 MiB v5e/v6e

    row_bytes = B * D * itemsize
    t_tile = _pick_time_tile(T, row_bytes, sub, buffer_budget)
    if max_tile_rows is not None:           # test/tuning override
        t_tile = min(t_tile, max(sub, (int(max_tile_rows) // sub) * sub))

    total_steps = pl.cdiv(T, t_tile)
    # Leading "parallel" axis: both v7x TensorCores stream half of T each;
    # harmless (sequential) on single-core v5e/v6e.
    num_splits = 2 if total_steps >= 2 else 1
    steps_per_split = pl.cdiv(total_steps, num_splits)
    t_padded = num_splits * steps_per_split * t_tile
    if t_padded != T:
        # Zero rows contribute nothing to the time-sum; mean still divides by T.
        visual_emb = jnp.pad(visual_emb, ((0, 0), (0, t_padded - T), (0, 0)))

    # ----- Kernel 1: streamed time-sum -> (num_splits, B, D) f32 partials -----
    reduce_need = (2 * B * t_tile * D * itemsize      # double-buffered visual tile
                   + 2 * B * D * 4)                   # double-buffered output partial
    reduce_vmem_limit = min(vmem_cap * 3 // 4, max(reduce_need + (8 << 20), 32 << 20))

    partials = pl.pallas_call(
        _tsum_kernel,
        out_shape=jax.ShapeDtypeStruct((num_splits, B, D), jnp.float32),
        grid=(num_splits, steps_per_split),
        in_specs=[
            # TODO(synk): if the producer can emit (T, B, D), stream contiguous
            # (t_tile, B, D) blocks instead (denser DMA runs when D is small).
            pl.BlockSpec((B, t_tile, D),
                         lambda p, k: (0, p * steps_per_split + k, 0)),
        ],
        # Each split accumulates into its own (B, D) slot -> safe with "parallel".
        out_specs=pl.BlockSpec((None, B, D), lambda p, k: (p, 0, 0)),
        compiler_params=pltpu.CompilerParams(
            dimension_semantics=("parallel", "arbitrary"),
            vmem_limit_bytes=int(reduce_vmem_limit)),
        cost_estimate=pl.CostEstimate(
            flops=B * t_padded * D,
            transcendentals=0,
            bytes_accessed=B * t_padded * D * itemsize + num_splits * B * D * 4),
    )(visual_emb)

    # ----- Kernel 2: tiny epilogue (combine + matmul + symmetric CE) -----
    scale = 1.0 / (float(T) * float(temperature))
    epi_need = (num_splits * B * D * 4 + B * D * t_itemsize
                + 4 * B * B * 4 + (4 << 20))
    epi_vmem_limit = min(vmem_cap * 3 // 4, max(epi_need, 32 << 20))

    out = pl.pallas_call(
        functools.partial(_epilogue_kernel, scale),
        out_shape=jax.ShapeDtypeStruct((1, 1), jnp.float32),
        in_specs=[
            pl.BlockSpec(memory_space=pltpu.MemorySpace.VMEM),
            pl.BlockSpec(memory_space=pltpu.MemorySpace.VMEM),
        ],
        # Scalar result through SMEM (no lane-sparse masked vst).
        out_specs=pl.BlockSpec(memory_space=pltpu.MemorySpace.SMEM),
        compiler_params=pltpu.CompilerParams(
            vmem_limit_bytes=int(epi_vmem_limit)),
        cost_estimate=pl.CostEstimate(
            flops=2 * B * B * D + 8 * B * B + 2 * num_splits * B * D,
            transcendentals=2 * B * B,
            bytes_accessed=num_splits * B * D * 4 + B * D * t_itemsize + 4),
    )(partials, text_emb)
    return out[0, 0]


# --------------------------------------------------------------------------
# Pure-JAX reference (mirrors the PyTorch module).
# --------------------------------------------------------------------------
def _reference_loss(visual_emb, text_emb, temperature=0.07):
    v = jnp.mean(visual_emb.astype(jnp.float32), axis=1)
    sim = v @ text_emb.astype(jnp.float32).T / temperature
    lse_r = jax.scipy.special.logsumexp(sim, axis=1)
    lse_c = jax.scipy.special.logsumexp(sim, axis=0)
    diag = jnp.diagonal(sim)
    loss_v2t = jnp.mean(lse_r - diag)
    loss_t2v = jnp.mean(lse_c - diag)
    return (loss_v2t + loss_t2v) / 2.0


if __name__ == "__main__":
    # Small demo shapes; T=24 with a forced 8-row tile exercises the
    # (parallel split, multi-step accumulate, zero-padding) paths.
    B, T, D = 8, 24, 128
    key = jax.random.PRNGKey(0)
    k1, k2 = jax.random.split(key)
    visual_emb = jax.random.normal(k1, (B, T, D), dtype=jnp.float32)
    text_emb = jax.random.normal(k2, (B, D), dtype=jnp.float32)

    loss = jax.block_until_ready(ntxent_loss(visual_emb, text_emb, 0.07,
                                             max_tile_rows=8))
    ref = jax.block_until_ready(_reference_loss(visual_emb, text_emb, 0.07))
    np.testing.assert_allclose(np.asarray(loss), np.asarray(ref),
                               rtol=1e-4, atol=1e-4)

    # Default (budget-derived) tiling path.
    loss2 = jax.block_until_ready(ntxent_loss(visual_emb, text_emb, 0.07))
    np.testing.assert_allclose(np.asarray(loss2), np.asarray(ref),
                               rtol=1e-4, atol=1e-4)

    # Also exercise the bf16 HBM / f32-accumulate path once.
    v_bf = visual_emb.astype(jnp.bfloat16)
    t_bf = text_emb.astype(jnp.bfloat16)
    loss_bf = jax.block_until_ready(ntxent_loss(v_bf, t_bf, 0.07))
    ref_bf = jax.block_until_ready(_reference_loss(v_bf, t_bf, 0.07))
    np.testing.assert_allclose(np.asarray(loss_bf), np.asarray(ref_bf),
                               rtol=2e-2, atol=2e-2)

    print("KERNEL_OK")
</pallas_src>

<mosaic_0001>
module attributes {stable_mosaic.version = 11 : i64} {
  func.func @_tsum_kernel(%arg0: i32, %arg1: i32, %arg2: memref<8x8x128xf32, #tpu.memory_space<vmem>>, %arg3: memref<1x8x128xf32, #tpu.memory_space<vmem>>) attributes {dimension_semantics = [#tpu.dimension_semantics<parallel>, #tpu.dimension_semantics<arbitrary>], iteration_bounds = array<i64: 2, 2>, scalar_prefetch = 0 : i64, scratch_operands = 0 : i64, tpu.core_type = #tpu.core_type<tc>, window_params = [{transform_indices = @transform_0, window_bounds = array<i64: 8, 8, 128>}, {transform_indices = @transform_1, window_bounds = array<i64: 1, 8, 128>}]} {
    %c0_i32 = arith.constant 0 : i32
    %0 = arith.cmpi eq, %arg1, %c0_i32 : i32
    %1 = arith.extui %0 : i1 to i32
    %c0_i32_0 = arith.constant 0 : i32
    %2 = arith.cmpi ne, %1, %c0_i32_0 : i32
    scf.if %2 {
      %cst_9 = arith.constant 0.000000e+00 : f32
      %11 = vector.broadcast %cst_9 : f32 to vector<8x128xf32>
      %c0_10 = arith.constant 0 : index
      %c0_11 = arith.constant 0 : index
      %c0_12 = arith.constant 0 : index
      %12 = vector.load %arg3[%c0_10, %c0_11, %c0_12] : memref<1x8x128xf32, #tpu.memory_space<vmem>>, vector<1x8x128xf32>
      %13 = vector.shape_cast %12 : vector<1x8x128xf32> to vector<8x128xf32>
      %14 = vector.shape_cast %11 : vector<8x128xf32> to vector<1x8x128xf32>
      tpu.vector_store %arg3[%c0_10, %c0_11, %c0_12], %14 {strides = array<i32>} : memref<1x8x128xf32, #tpu.memory_space<vmem>>, vector<1x8x128xf32>,
    } else {
    }
    %c0 = arith.constant 0 : index
    %c0_1 = arith.constant 0 : index
    %c0_2 = arith.constant 0 : index
    %3 = vector.load %arg3[%c0, %c0_1, %c0_2] : memref<1x8x128xf32, #tpu.memory_space<vmem>>, vector<1x8x128xf32>
    %4 = vector.shape_cast %3 : vector<1x8x128xf32> to vector<8x128xf32>
    %c0_3 = arith.constant 0 : index
    %c0_4 = arith.constant 0 : index
    %c0_5 = arith.constant 0 : index
    %5 = vector.load %arg2[%c0_3, %c0_4, %c0_5] : memref<8x8x128xf32, #tpu.memory_space<vmem>>, vector<8x8x128xf32>
    %cst = arith.constant dense<0.000000e+00> : vector<8x128xf32>
    %6 = vector.multi_reduction <add>, %5, %cst [1] : vector<8x8x128xf32> to vector<8x128xf32>
    %7 = arith.addf %4, %6 : vector<8x128xf32>
    %c0_6 = arith.constant 0 : index
    %c0_7 = arith.constant 0 : index
    %c0_8 = arith.constant 0 : index
    %8 = vector.load %arg3[%c0_6, %c0_7, %c0_8] : memref<1x8x128xf32, #tpu.memory_space<vmem>>, vector<1x8x128xf32>
    %9 = vector.shape_cast %8 : vector<1x8x128xf32> to vector<8x128xf32>
    %10 = vector.shape_cast %7 : vector<8x128xf32> to vector<1x8x128xf32>
    tpu.vector_store %arg3[%c0_6, %c0_7, %c0_8], %10 {strides = array<i32>} : memref<1x8x128xf32, #tpu.memory_space<vmem>>, vector<1x8x128xf32>,
    return
  }
  func.func @transform_0(%arg0: i32, %arg1: i32) -> (i32, i32, i32) {
    %c2_i32 = arith.constant 2 : i32
    %0 = arith.muli %arg0, %c2_i32 : i32
    %1 = arith.addi %0, %arg1 : i32
    %c0_i32 = arith.constant 0 : i32
    %c0_i32_0 = arith.constant 0 : i32
    %c0_i32_1 = arith.constant 0 : i32
    return %c0_i32, %1, %c0_i32_0 : i32, i32, i32
  }
  func.func @transform_1(%arg0: i32, %arg1: i32) -> (i32, i32, i32) {
    %c0_i32 = arith.constant 0 : i32
    %c0_i32_0 = arith.constant 0 : i32
    %c0_i32_1 = arith.constant 0 : i32
    return %arg0, %c0_i32, %c0_i32_0 : i32, i32, i32
  }
}

</mosaic_0001>

<bundles_post_ra>
// kernel: tpu_custom_call.1
= control target key start
LH: loop header
LB: loop body
LE: loop exit
PB: predicated region body
PF: predicated region fallthrough
CT: control target
= control target key end

     0   :  { %6 = vsyncpa [#allocation3], 0  ;;  %s819_s0 = inlined_call_operand.hbm [shape: f32[8,32,128], index: 0, kind: input, shape index: {}]   ;;  %s820_s1 = inlined_call_operand.hbm [shape: f32[2,8,128], index: 1, kind: output, shape index: {}]  }
   0x1   :  { %8 = vsyncpa [#allocation3 + $0x1], 0 }
   0x2   :  { %9 = vsyncpa [#allocation4], 0 }
   0x3   :  { %11 = vsyncpa [#allocation4 + $0x1], 0  ;;  %s633_s6 = smov 0   ;;  %s635_s7 = smov 0  }
   0x4   :  { %s637_s8 = smov 0   ;;  %s639_s9 = smov 0  }
   0x5   :  { %s641_s10 = smov 0   ;;  %s643_s11 = smov 0  }
   0x6   :  { %s645_s12 = smov 0   ;;  %s647_s13 = smov 0  }
   0x7   :  { %s649_s14 = smov 0   ;;  %s651_s15 = smov 0  }
   0x8   :  { %s653_s16 = smov 0  }
   0x9 LB: > { %824 = sst [smem:[#allocation8_spill]] %s613_s15  ;;  %s342_s17 = sadd.s32 4294967295, %s617_s16   ;;  %s617_s16 = sphi %s653_s16, %s17_s16   ;;  %s613_s15 = sphi %s651_s15, %s833_s15   ;;  %s609_s14 = sphi %s649_s14, %s841_s14   ;;  %s605_s13 = sphi %s647_s13, %s831_s13   ;;  %s601_s12 = sphi %s645_s12, %s840_s12   ;;  %s597_s11 = sphi %s643_s11, %s839_s11   ;;  %s593_s10 = sphi %s641_s10, %s838_s10   ;;  %s589_s9 = sphi %s639_s9, %s837_s9   ;;  %s585_s8 = sphi %s637_s8, %s836_s8   ;;  %s581_s7 = sphi %s635_s7, %s835_s7   ;;  %s577_s6 = sphi %s633_s6, %s834_s6  }
   0xa   : > { %s343_s18 = sadd.s32 4294967294, %s617_s16   ;;  %s26_s19 = sadd.s32 1, %s609_s14 }
   0xb   : > { %s29_s20 = sadd.s32 1, %s613_s15  ;;  %p27_p0 = scmp.ge.s32.totalorder %s26_s19, 2 }
   0xc   : > { %s344_s21 = sshll.u32 %s613_s15, 1  ;;  %s40_s23 = sadd.s32 1, %s597_s11 }
   0xd   : > { %s692_s22 = sadd.s32 %s609_s14, %s344_s21  ;;  %s843_s19 = smov (%p27_p0, %s26_s19), 0 }
   0xe   : > { %825 = sst [smem:[#allocation9_spill]] %s843_s19  ;;  %s845_s20 = smov (!%p27_p0, %s29_s20), %s613_s15 }
   0xf   : > { %p47_p1 = scmp.ne.s32.totalorder %s597_s11, %s593_s10  ;;  %p48_p2 = scmp.eq.s32.totalorder %s617_s16, 0 }
  0x10   : > { %p31_p3 = scmp.ge.s32.totalorder %s845_s20, 2  ;;  %p53_p4 = scmp.ne.s32.totalorder %s593_s10, %s589_s9 }
  0x11   : > { %p702_p5 = por %p48_p2, %p47_p1  ;;  %p54_p6 = scmp.eq.s32.totalorder %s342_s17, 0 }
  0x12   : > { %s847_s20 = smov (%p31_p3, %s845_s20), 0  ;;  %s66_s26 = sadd.s32 1, %s585_s8 }
  0x13   : > { %827 = sst [smem:[#allocation10_spill]] %s847_s20  ;;  %p708_p7 = por %p54_p6, %p53_p4 }
  0x14   : > { %s345_s27 = sshll.u32 %s847_s20, 1  ;;  %s63_s28 = ssub.s32 %s613_s15, %s847_s20 }
  0x15   : > { %s36_s29 = sadd.s32 %s345_s27, %s843_s19  ;;  %p64_p8 = scmp.eq.s32.totalorder %s63_s28, 0 }
  0x16   : > { %s37_s30 = ssub.s32 %s692_s22, %s36_s29  ;;  %p76_p9 = scmp.ne.s32.totalorder %s585_s8, %s581_s7 }
  0x17   : > { %p38_p10 = scmp.eq.s32.totalorder %s37_s30, 0  ;;  %p77_p11 = scmp.eq.s32.totalorder %s342_s17, 3 }
  0x18   : > { %s721_s2 = scalar_select %p64_p8, %s585_s8, %s66_s26  }
  0x19   : > { %s724_s3 = scalar_select %p38_p10, %s597_s11, %s40_s23  }
  0x1a   : > { %p726_p12 = por %p77_p11, %p76_p9  ;;  %p82_p13 = scmp.ne.s32.totalorder %s581_s7, %s577_s6 }
  0x1b   : > { %p83_p0 = scmp.eq.s32.totalorder %s343_s18, 3  ;;  %p371_p1 = scmp.lt.s32.totalorder %s617_s16, 4 }
  0x1c   : > { %s103_s5 = sand.u32 1, %s597_s11   ;;  %s350_s21 = sshll.u32 %s692_s22, 3 }
  0x1d   : > { %p736_p2 = por %p83_p0, %p82_p13  ;;  %s348_s17 = sshll.u32 %s103_s5, 6 }
  0x1e   : > { %s113_s27 = scalar_lea.hbm %s819_s0, %s350_s21  ;;  %s107_s29 = scalar_lea.vmem [#allocation2], %s348_s17 }
  0x1f   : > { %s114_s28 = sshll.u32 %s113_s27, 4  ;;  %s116_s30 = sshll.u32 %s107_s29, 4  ;;  %s115_s28 = int_to_ptr.hbm [resolvable:$true] %s114_s28  ;;  %s117_s30 = int_to_ptr.vmem [resolvable:$true] %s116_s30 }
  0x20   : > { %p364_p3 = pnand %p371_p1, %p702_p5  ;;  %p351_p4 = scmp.ge.s32.totalorder %s617_s16, 1 }
  0x21   : > { %s104_s18 = scalar_lea.sflag [#allocation3], %s103_s5  ;;  %s619_s20 = smov 512  }
  0x22   : > { %s620_s19 = smov 128   ;;  %s621_s15 = smov 8  }
  0x23   : > { %366 = dma.hbm_to_vmem [thread:$0]  (!%p364_p3), %s115_s28, 1024, %s117_s30, %s104_s18, %s619_s20, %s620_s19, %s621_s15  }
  0x24   : > { %p124_p6 = scmp.lt.s32.totalorder %s617_s16, 5 }
  0x26   : > { %p125_p8 = pnand %p351_p4, %p124_p6 }
  0x27   : > { %s130_s22 = sand.u32 (!%p125_p8), 1, %s593_s10  }
  0x28   : > { %128 = sbr.rel (%p125_p8) target bundleno = 80 (0x50), region = 24  ;;  %s352_s21 = sshll.u32 (!%p125_p8), %s130_s22, 6 }
  0x29   : > { %s131_s26 = scalar_lea.sflag (!%p125_p8), [#allocation3], %s130_s22  ;;  %s134_s17 = scalar_lea.vmem (!%p125_p8), [#allocation2], %s352_s21 }
  0x2d   : > { %568 = dma.done.wait (%p708_p7), %s131_s26, 1024  }
  0x2e   : > { %570 = vsyncadd (%p708_p7), %s131_s26, 4294966272  ;;  %s151_s24 = sand.u32 1, %s581_s7   ;;  %p354_p5 = scmp.ne.s32.totalorder %s601_s12, 0 }
  0x2f   : > { %s353_s5 = sshll.u32 %s151_s24, 3 }
  0x30   : > { %s756_s15 = scalar_lea.vmem [#allocation5], %s353_s5  ;;  %159 = sbr.rel (%p354_p5) target bundleno = 55 (0x37), region = 32 }
  0x35   : > { %v622_v0 = vmov 0.0  }
  0x36   : > { %160 = vst [vmem:[%s756_s15] sm:$0xff] %v622_v0 }
  0x37 PF: > { %v162_v1 = vld [vmem:[%s134_s17] sm:$0xff]  ;;  %v163_v2 = vld [vmem:[%s134_s17 + $0x8] sm:$0xff]  ;;  %v164_v3 = vld [vmem:[%s134_s17 + $0x10] sm:$0xff]  ;;  %vm226_vm0 = vcmask 1041409   ;;  %vm228_vm1 = vcmask 1042434   ;;  %vm230_vm2 = vcmask 1043459  }
  0x38   : > { %v165_v4 = vld [vmem:[%s134_s17 + $0x18] sm:$0xff]  ;;  %v166_v5 = vld [vmem:[%s134_s17 + $0x20] sm:$0xff]  ;;  %v170_v6 = vrot.slane %v162_v1, 4  ;;  %v176_v7 = vrot.slane %v163_v2, 4  ;;  %v167_v8 = vld [vmem:[%s134_s17 + $0x28] sm:$0xff]  ;;  %v182_v11 = vrot.slane %v164_v3, 4 }
  0x39   : > { %v168_v9 = vld [vmem:[%s134_s17 + $0x30] sm:$0xff]  ;;  %v169_v10 = vld [vmem:[%s134_s17 + $0x38] sm:$0xff]  ;;  %v188_v12 = vrot.slane %v165_v4, 4  ;;  %v194_v13 = vrot.slane %v166_v5, 4  ;;  %v200_v16 = vrot.slane %v167_v8, 4  ;;  %s356_s12 = sshll.u32 %s605_s13, 3 }
  0x3a   : > { %v171_v14 = vadd.f32 %v170_v6, %v162_v1  ;;  %v177_v15 = vadd.f32 %v176_v7, %v163_v2  ;;  %v206_v17 = vrot.slane %v168_v9, 4  ;;  %v183_v18 = vadd.f32 %v182_v11, %v164_v3  ;;  %s254_s25 = scalar_lea.hbm %s820_s1, %s356_s12  ;;  %s256_s13 = sshll.u32 %s756_s15, 4  ;;  %s257_s13 = int_to_ptr.vmem [resolvable:$true] %s256_s13 }
  0x3b   : > { %v189_v19 = vadd.f32 %v188_v12, %v165_v4  ;;  %v195_v20 = vadd.f32 %v194_v13, %v166_v5  ;;  %v212_v21 = vrot.slane %v169_v10, 4  ;;  %v201_v24 = vadd.f32 %v200_v16, %v167_v8  ;;  %s258_s23 = sshll.u32 %s254_s25, 4  ;;  %s244_s27 = scalar_lea.sflag [#allocation4], %s151_s24  ;;  %s259_s23 = int_to_ptr.hbm [resolvable:$true] %s258_s23 }
  0x3c   : > { %v172_v22 = vrot.slane %v171_v14, 2  ;;  %v178_v23 = vrot.slane %v177_v15, 2  ;;  %v207_v25 = vadd.f32 %v206_v17, %v168_v9  ;;  %v184_v26 = vrot.slane %v183_v18, 2  ;;  %s509_s28 = sshra.s32 %s259_s23, 4  ;;  %s515_s22 = scalar_lea.hbm %s820_s1, 16  ;;  %s510_s28 = int_to_ptr.hbm [resolvable:$true] %s509_s28 }
  0x3d   : > { %v190_v27 = vrot.slane %v189_v19, 2  ;;  %v196_v28 = vrot.slane %v195_v20, 2  ;;  %v213_v29 = vadd.f32 %v212_v21, %v169_v10  ;;  %v202_v32 = vrot.slane %v201_v24, 2  ;;  %v161_v61 = vld [vmem:[%s756_s15] sm:$0xff]  ;;  %s511_s29 = scalar_lea.hbm %s510_s28, 8  ;;  %p516_p11 = scmp.lt.s32.totalorder %s510_s28, %s820_s1 }
  0x3e   : > { %v173_v30 = vadd.f32 %v172_v22, %v171_v14  ;;  %v179_v31 = vadd.f32 %v178_v23, %v177_v15  ;;  %v208_v33 = vrot.slane %v207_v25, 2  ;;  %v185_v34 = vadd.f32 %v184_v26, %v183_v18  ;;  %p512_p7 = scmp.ne.s32.totalorder %s510_s28, %s511_s29  ;;  %p517_p13 = scmp.lt.s32.totalorder %s515_s22, %s511_s29 }
  0x3f   : > { %v191_v35 = vadd.f32 %v190_v27, %v189_v19  ;;  %v197_v36 = vadd.f32 %v196_v28, %v195_v20  ;;  %v214_v37 = vrot.slane %v213_v29, 2  ;;  %v203_v40 = vadd.f32 %v202_v32, %v201_v24 }
  0x40   : > { %v174_v38 = vrot.slane %v173_v30, 1  ;;  %v180_v39 = vrot.slane %v179_v31, 1  ;;  %v209_v41 = vadd.f32 %v208_v33, %v207_v25  ;;  %v186_v42 = vrot.slane %v185_v34, 1  ;;  %p513_p9 = pnand %p512_p7, %p726_p12  ;;  %p518_p0 = por %p517_p13, %p516_p11 }
  0x41   : > { %v192_v43 = vrot.slane %v191_v35, 1  ;;  %v198_v44 = vrot.slane %v197_v36, 1  ;;  %v215_v45 = vadd.f32 %v214_v37, %v213_v29  ;;  %v204_v48 = vrot.slane %v203_v40, 1 }
  0x42   : > { %v175_v46 = vadd.f32 %v174_v38, %v173_v30  ;;  %v181_v47 = vadd.f32 %v180_v39, %v179_v31  ;;  %v210_v49 = vrot.slane %v209_v41, 1  ;;  %v187_v50 = vadd.f32 %v186_v42, %v185_v34  ;;  %p514_p10 = pneg %p513_p9 }
  0x43   : > { %v193_v51 = vadd.f32 %v192_v43, %v191_v35  ;;  %v199_v52 = vadd.f32 %v198_v44, %v197_v36  ;;  %v216_v53 = vrot.slane %v215_v45, 1  ;;  %v205_v54 = vadd.f32 %v204_v48, %v203_v40 }
  0x44   : > { %v227_v55 = vsel %vm226_vm0, %v181_v47, %v175_v46  ;;  %vm232_vm3 = vcmask 1044484   ;;  %v211_v56 = vadd.f32 %v210_v49, %v209_v41  ;;  %vm234_vm4 = vcmask 1045509   ;;  %p519_p1 = pnand %p518_p0, %p514_p10 }
  0x45   : > { %v229_v57 = vsel %vm228_vm1, %v187_v50, %v227_v55  ;;  %v217_v58 = vadd.f32 %v216_v53, %v215_v45  ;;  %vm236_vm5 = vcmask 1046534   ;;  %vm238_vm6 = vcmask 1047559  }
  0x46   : > { %v231_v59 = vsel %vm230_vm2, %v193_v51, %v229_v57 }
  0x47   : > { %v233_v60 = vsel %vm232_vm3, %v199_v52, %v231_v59 }
  0x48   : > { %v235_v62 = vsel %vm234_vm4, %v205_v54, %v233_v60 }
  0x49   : > { %v237_v63 = vsel %vm236_vm5, %v211_v56, %v235_v62 }
  0x4a   : > { %v239_v0 = vsel %vm238_vm6, %v217_v58, %v237_v63 }
  0x4b   : > { %v241_v1 = vadd.f32 %v239_v0, %v161_v61 }
  0x4d   : > { %242 = vst [vmem:[%s756_s15] sm:$0xff] %v241_v1 }
  0x4e   : > { %522 = shalt.err (!%p519_p1)
}
  0x4f   : > { %361 = dma.vmem_to_hbm [thread:$0]  (%p726_p12), %s257_s13, 128, %s259_s23, %s244_s27  }
  0x50 PF: > { %p372_p3 = scmp.ge.s32.totalorder %s617_s16, 2  ;;  %s270_s17 = sand.u32 1, %s577_s6  }
  0x51   : > { %s271_s24 = scalar_lea.sflag [#allocation4], %s270_s17 }
  0x52   : > { %p368_p4 = pnand %p372_p3, %p736_p2 }
  0x54   : > { %p369_p6 = pneg %p368_p4 }
  0x56   : > { %572 = dma.done.wait (%p369_p6), %s271_s24, 128  }
  0x57   : > { %574 = vsyncadd (%p369_p6), %s271_s24, 4294967168  ;;  %s17_s16 = sadd.s32 1, %s617_s16   ;;  %s831_s13 = sld [smem:[#allocation8_spill]] }
  0x58   : > { %p14_p8 = scmp.ge.s32.totalorder %s17_s16, 6   ;;  %s832_s4 = sld [smem:[#allocation9_spill]] }
  0x59   : > { %s833_s15 = sld [smem:[#allocation10_spill]]  ;;  %s834_s6 = smov %s581_s7 }
  0x5a   : > { %s835_s7 = smov %s585_s8  ;;  %s836_s8 = smov %s721_s2 }
  0x5b   : > { %s837_s9 = smov %s593_s10  ;;  %s838_s10 = smov %s597_s11 }
  0x5c   : > { %s839_s11 = smov %s724_s3  ;;  %s840_s12 = smov %s609_s14 }
  0x5d   :  { %16 = sbr.rel (!%p14_p8) target bundleno = 9 (0x9), region = 73 }
  0x5e   : > { %s841_s14 = smov %s832_s4 }
  0x62   :  { %277 = vsyncpa [#allocation3], 1 }
  0x63   :  { %279 = vsyncpa [#allocation3 + $0x1], 1 }
  0x64   :  { %280 = vsyncpa [#allocation4], 1 }
  0x65   :  { %282 = vsyncpa [#allocation4 + $0x1], 1 }

</bundles_post_ra>
